<compile_context>
chip_gen: v7x
topology: tpu7x:2x2x1
jax: 0.10.0
libtpu: 0.0.40
codegen_flags: <defaults>
</compile_context>

<pallas_src>
import numpy as np
import jax
import jax.numpy as jnp
from jax.experimental import pallas as pl
from jax.experimental.pallas import tpu as pltpu

_DEF_TILE_M = 4096
_VMEM_LIMIT = 32 * 1024 * 1024  # safe on v5e/v6e/v7x


def _round_up(x, m):
    return ((x + m - 1) // m) * m


# ---------------------------------------------------------------------------
# Kernel 1: fused 3-layer MLP (used for encoderNet and decoderNet)
#   y = tanh(tanh(x @ W1 + b1) @ W2 + b2) @ W3 + b3
# Weights arrive pre-transposed as (in, out); biases as (1, out) float32.
# Accumulation / bias / tanh in float32 regardless of storage dtype.
# ---------------------------------------------------------------------------
def _mlp_kernel(x_ref, w1_ref, b1_ref, w2_ref, b2_ref, w3_ref, b3_ref, o_ref):
    cdt = w1_ref.dtype
    h1 = jnp.tanh(
        jnp.dot(x_ref[...], w1_ref[...], preferred_element_type=jnp.float32)
        + b1_ref[...]
    )
    h2 = jnp.tanh(
        jnp.dot(h1.astype(cdt), w2_ref[...], preferred_element_type=jnp.float32)
        + b2_ref[...]
    )
    y = (
        jnp.dot(h2.astype(cdt), w3_ref[...], preferred_element_type=jnp.float32)
        + b3_ref[...]
    )
    o_ref[...] = y.astype(o_ref.dtype)


# ---------------------------------------------------------------------------
# Kernel 2: fused rollout step:  q_new = q @ A^T ; states = decoder(q_new)
# q and A are kept in float32 (tiny, precision-critical for the chained
# dynamics); decoder weights may be bf16.
# ---------------------------------------------------------------------------
def _dyn_decode_kernel(q_ref, a_ref, w1_ref, b1_ref, w2_ref, b2_ref,
                       w3_ref, b3_ref, qn_ref, s_ref):
    cdt = w1_ref.dtype
    q_new = jnp.dot(q_ref[...], a_ref[...], preferred_element_type=jnp.float32)
    qn_ref[...] = q_new.astype(qn_ref.dtype)
    h1 = jnp.tanh(
        jnp.dot(q_new.astype(cdt), w1_ref[...], preferred_element_type=jnp.float32)
        + b1_ref[...]
    )
    h2 = jnp.tanh(
        jnp.dot(h1.astype(cdt), w2_ref[...], preferred_element_type=jnp.float32)
        + b2_ref[...]
    )
    y = (
        jnp.dot(h2.astype(cdt), w3_ref[...], preferred_element_type=jnp.float32)
        + b3_ref[...]
    )
    s_ref[...] = y.astype(s_ref.dtype)


# ---------------------------------------------------------------------------
# Wrappers
# ---------------------------------------------------------------------------
def _mlp_forward(x2d, w1t, b1, w2t, b2, w3t, b3, *,
                 tile_m=_DEF_TILE_M, compute_dtype=jnp.float32):
    M, d_in = x2d.shape
    h = w1t.shape[1]
    d_out = w3t.shape[1]

    tm = min(tile_m, _round_up(max(M, 1), 16))
    m_pad = _round_up(M, tm)
    if m_pad != M:
        x2d = jnp.pad(x2d, ((0, m_pad - M), (0, 0)))

    xc = x2d.astype(compute_dtype)
    w1c, w2c, w3c = (w.astype(compute_dtype) for w in (w1t, w2t, w3t))
    b1f, b2f, b3f = (b.astype(jnp.float32) for b in (b1, b2, b3))

    cbytes = jnp.dtype(compute_dtype).itemsize
    cost = pl.CostEstimate(
        flops=2 * m_pad * (d_in * h + h * h + h * d_out),
        transcendentals=2 * m_pad * h,
        bytes_accessed=m_pad * (d_in * cbytes + d_out * 4)
        + (d_in * h + h * h + h * d_out) * cbytes,
    )

    const = lambda i: (0, 0)
    out = pl.pallas_call(
        _mlp_kernel,
        out_shape=jax.ShapeDtypeStruct((m_pad, d_out), jnp.float32),
        grid_spec=pltpu.PrefetchScalarGridSpec(
            num_scalar_prefetch=0,
            grid=(m_pad // tm,),
            in_specs=[
                pl.BlockSpec((tm, d_in), lambda i: (i, 0)),
                pl.BlockSpec((d_in, h), const),
                pl.BlockSpec((1, h), const),
                pl.BlockSpec((h, h), const),
                pl.BlockSpec((1, h), const),
                pl.BlockSpec((h, d_out), const),
                pl.BlockSpec((1, d_out), const),
            ],
            out_specs=pl.BlockSpec((tm, d_out), lambda i: (i, 0)),
        ),
        compiler_params=pltpu.CompilerParams(
            dimension_semantics=("parallel",),
            vmem_limit_bytes=_VMEM_LIMIT,
        ),
        cost_estimate=cost,
    )(xc, w1c, b1f, w2c, b2f, w3c, b3f)
    return out[:M]


def _dyn_decode_step(q, a_t, w1t, b1, w2t, b2, w3t, b3, *,
                     tile_m=_DEF_TILE_M, compute_dtype=jnp.float32):
    M, g = q.shape
    h = w1t.shape[1]
    d_out = w3t.shape[1]

    tm = min(tile_m, _round_up(max(M, 1), 16))
    m_pad = _round_up(M, tm)
    if m_pad != M:
        q = jnp.pad(q, ((0, m_pad - M), (0, 0)))

    qf = q.astype(jnp.float32)
    af = a_t.astype(jnp.float32)
    w1c, w2c, w3c = (w.astype(compute_dtype) for w in (w1t, w2t, w3t))
    b1f, b2f, b3f = (b.astype(jnp.float32) for b in (b1, b2, b3))

    cbytes = jnp.dtype(compute_dtype).itemsize
    cost = pl.CostEstimate(
        flops=2 * m_pad * (g * g + g * h + h * h + h * d_out),
        transcendentals=2 * m_pad * h,
        bytes_accessed=m_pad * (2 * g * 4 + d_out * 4)
        + g * g * 4 + (g * h + h * h + h * d_out) * cbytes,
    )

    const = lambda i: (0, 0)
    q_new, states = pl.pallas_call(
        _dyn_decode_kernel,
        out_shape=(
            jax.ShapeDtypeStruct((m_pad, g), jnp.float32),
            jax.ShapeDtypeStruct((m_pad, d_out), jnp.float32),
        ),
        grid_spec=pltpu.PrefetchScalarGridSpec(
            num_scalar_prefetch=0,
            grid=(m_pad // tm,),
            in_specs=[
                pl.BlockSpec((tm, g), lambda i: (i, 0)),
                pl.BlockSpec((g, g), const),
                pl.BlockSpec((g, h), const),
                pl.BlockSpec((1, h), const),
                pl.BlockSpec((h, h), const),
                pl.BlockSpec((1, h), const),
                pl.BlockSpec((h, d_out), const),
                pl.BlockSpec((1, d_out), const),
            ],
            out_specs=(
                pl.BlockSpec((tm, g), lambda i: (i, 0)),
                pl.BlockSpec((tm, d_out), lambda i: (i, 0)),
            ),
        ),
        compiler_params=pltpu.CompilerParams(
            dimension_semantics=("parallel",),
            vmem_limit_bytes=_VMEM_LIMIT,
        ),
        cost_estimate=cost,
    )(qf, af, w1c, b1f, w2c, b2f, w3c, b3f)
    return q_new[:M], states[:M]


# ---------------------------------------------------------------------------
# Parameter init (matches PyTorch init: xavier_normal_ weights, zero biases,
# dynamics weight = 0.001 everywhere, backdynamics = pinv(dynamics weight)).
# Weights are stored transposed (in, out) so the kernel needs no .T.
# ---------------------------------------------------------------------------
def init_koopman_params(key, state_dim, g_dim, n_timesteps, alpha=1,
                        dtype=jnp.float32):
    h = 16 * alpha
    n_in = state_dim * n_timesteps  # deriv_in_state=False

    def xavier_t(k, in_f, out_f):
        std = (2.0 / (in_f + out_f)) ** 0.5
        return (jax.random.normal(k, (in_f, out_f)) * std).astype(dtype)

    ks = jax.random.split(key, 6)
    enc = {
        "w1": xavier_t(ks[0], n_in, h), "b1": jnp.zeros((1, h), dtype),
        "w2": xavier_t(ks[1], h, h),    "b2": jnp.zeros((1, h), dtype),
        "w3": xavier_t(ks[2], h, g_dim), "b3": jnp.zeros((1, g_dim), dtype),
    }
    dec = {
        "w1": xavier_t(ks[3], g_dim, h), "b1": jnp.zeros((1, h), dtype),
        "w2": xavier_t(ks[4], h, h),     "b2": jnp.zeros((1, h), dtype),
        "w3": xavier_t(ks[5], h, state_dim), "b3": jnp.zeros((1, state_dim), dtype),
    }
    a = np.full((g_dim, g_dim), 0.001, dtype=np.float32)   # dynamics.weight
    a_back = np.linalg.pinv(a)                              # dynamics_back.weight
    dyn = {"A_t": jnp.asarray(a.T), "A_back_t": jnp.asarray(a_back.T)}
    return {"enc": enc, "dec": dec, "dyn": dyn,
            "dims": (n_in, g_dim, state_dim, h)}


# ---------------------------------------------------------------------------
# KoopmanOperators.forward  (encoder == self.mapping, decoder == self.inv_mapping)
# ---------------------------------------------------------------------------
def koopman_forward(x, params, mode="forward", *,
                    tile_m=_DEF_TILE_M, compute_dtype=jnp.float32):
    n_in, g_dim, state_dim, h = params["dims"]
    enc, dec, dyn = params["enc"], params["dec"], params["dyn"]
    steps = x.shape[1]

    xf = x.reshape(-1, n_in)
    z = _mlp_forward(xf, enc["w1"], enc["b1"], enc["w2"], enc["b2"],
                     enc["w3"], enc["b3"],
                     tile_m=tile_m, compute_dtype=compute_dtype)

    a_t = dyn["A_t"] if mode == "forward" else dyn["A_back_t"]
    q = z
    outs = []
    for _ in range(steps):
        q, s = _dyn_decode_step(q, a_t, dec["w1"], dec["b1"], dec["w2"],
                                dec["b2"], dec["w3"], dec["b3"],
                                tile_m=tile_m, compute_dtype=compute_dtype)
        outs.append(s)
    outs.append(_mlp_forward(z, dec["w1"], dec["b1"], dec["w2"], dec["b2"],
                             dec["w3"], dec["b3"],
                             tile_m=tile_m, compute_dtype=compute_dtype))
    if mode == "forward":
        return outs, []
    return [], outs


# ---------------------------------------------------------------------------
# Pure-JAX reference
# ---------------------------------------------------------------------------
def _reference_forward(x, params, mode="forward"):
    n_in, g_dim, state_dim, h = params["dims"]
    enc, dec, dyn = params["enc"], params["dec"], params["dyn"]

    def mlp(v, p):
        h1 = jnp.tanh(v @ p["w1"].astype(jnp.float32) + p["b1"])
        h2 = jnp.tanh(h1 @ p["w2"].astype(jnp.float32) + p["b2"])
        return h2 @ p["w3"].astype(jnp.float32) + p["b3"]

    xf = x.reshape(-1, n_in).astype(jnp.float32)
    z = mlp(xf, enc)
    a_t = dyn["A_t"] if mode == "forward" else dyn["A_back_t"]
    q = z
    outs = []
    for _ in range(x.shape[1]):
        q = q @ a_t
        outs.append(mlp(q, dec))
    outs.append(mlp(z, dec))
    if mode == "forward":
        return outs, []
    return [], outs


if __name__ == "__main__":
    state_dim, g_dim, n_timesteps, alpha = 8, 8, 4, 1
    n_in = state_dim * n_timesteps  # encoder input dim = 32

    key = jax.random.PRNGKey(0)
    kx, kp = jax.random.split(key)
    x = jax.random.normal(kx, (2, 4, n_in), dtype=jnp.float32)  # (B, steps, N_in)
    params = init_koopman_params(kp, state_dim, g_dim, n_timesteps, alpha)

    M = x.size // n_in
    steps = x.shape[1]

    # float32 path: forward + backward modes, strict check vs JAX reference.
    for mode in ("forward", "backward"):
        out, out_back = koopman_forward(x, params, mode=mode,
                                        compute_dtype=jnp.float32)
        got = out if mode == "forward" else out_back
        got = jax.block_until_ready(jnp.stack(got, axis=1))
        ref_f, ref_b = _reference_forward(x, params, mode=mode)
        ref = jnp.stack(ref_f if mode == "forward" else ref_b, axis=1)
        assert got.shape == (M, steps + 1, state_dim)
        assert jnp.allclose(got, ref, atol=2e-3, rtol=2e-3), \
            float(jnp.max(jnp.abs(got - ref)))

    # bf16 storage path (v6e/v7x HBM optimization; f32 accumulate + tanh in-kernel).
    out_bf16, _ = koopman_forward(x, params, mode="forward",
                                  compute_dtype=jnp.bfloat16)
    out_bf16 = jax.block_until_ready(jnp.stack(out_bf16, axis=1))
    ref_f, _ = _reference_forward(x, params, mode="forward")
    ref = jnp.stack(ref_f, axis=1)
    assert float(jnp.max(jnp.abs(out_bf16 - ref))) < 0.1

    print("KERNEL_OK")
</pallas_src>

<mosaic_0001>
module attributes {stable_mosaic.version = 11 : i64} {
  func.func @_mlp_kernel(%arg0: i32, %arg1: memref<16x32xf32, #tpu.memory_space<vmem>>, %arg2: memref<32x16xf32, #tpu.memory_space<vmem>>, %arg3: memref<1x16xf32, #tpu.memory_space<vmem>>, %arg4: memref<16x16xf32, #tpu.memory_space<vmem>>, %arg5: memref<1x16xf32, #tpu.memory_space<vmem>>, %arg6: memref<16x8xf32, #tpu.memory_space<vmem>>, %arg7: memref<1x8xf32, #tpu.memory_space<vmem>>, %arg8: memref<16x8xf32, #tpu.memory_space<vmem>>) attributes {dimension_semantics = [#tpu.dimension_semantics<parallel>], iteration_bounds = array<i64: 1>, scalar_prefetch = 0 : i64, scratch_operands = 0 : i64, tpu.core_type = #tpu.core_type<tc>, window_params = [{transform_indices = @transform_0, window_bounds = array<i64: 16, 32>}, {pipeline_mode = #tpu.pipeline_mode<synchronous>, transform_indices = @transform_1, window_bounds = array<i64: 32, 16>}, {pipeline_mode = #tpu.pipeline_mode<synchronous>, transform_indices = @transform_2, window_bounds = array<i64: 1, 16>}, {pipeline_mode = #tpu.pipeline_mode<synchronous>, transform_indices = @transform_3, window_bounds = array<i64: 16, 16>}, {pipeline_mode = #tpu.pipeline_mode<synchronous>, transform_indices = @transform_4, window_bounds = array<i64: 1, 16>}, {pipeline_mode = #tpu.pipeline_mode<synchronous>, transform_indices = @transform_5, window_bounds = array<i64: 16, 8>}, {pipeline_mode = #tpu.pipeline_mode<synchronous>, transform_indices = @transform_6, window_bounds = array<i64: 1, 8>}, {transform_indices = @transform_7, window_bounds = array<i64: 16, 8>}]} {
    %c0 = arith.constant 0 : index
    %c0_0 = arith.constant 0 : index
    %0 = vector.load %arg1[%c0, %c0_0] : memref<16x32xf32, #tpu.memory_space<vmem>>, vector<16x32xf32>
    %c0_1 = arith.constant 0 : index
    %c0_2 = arith.constant 0 : index
    %1 = vector.load %arg2[%c0_1, %c0_2] : memref<32x16xf32, #tpu.memory_space<vmem>>, vector<32x16xf32>
    %cst = arith.constant dense<0.000000e+00> : vector<16x16xf32>
    %2 = tpu.matmul %0, %1, %cst {dimension_numbers = #tpu.dot_dimension_numbers<[1], [0], [0], [1], [0, 0, 1, 1], [], []>} : vector<16x32xf32>, vector<32x16xf32>, vector<16x16xf32> -> vector<16x16xf32>
    %c0_3 = arith.constant 0 : index
    %c0_4 = arith.constant 0 : index
    %3 = vector.load %arg3[%c0_3, %c0_4] : memref<1x16xf32, #tpu.memory_space<vmem>>, vector<1x16xf32>
    %4 = vector.broadcast %3 : vector<1x16xf32> to vector<16x16xf32>
    %5 = arith.addf %2, %4 : vector<16x16xf32>
    %6 = math.tanh %5 : vector<16x16xf32>
    %c0_5 = arith.constant 0 : index
    %c0_6 = arith.constant 0 : index
    %7 = vector.load %arg4[%c0_5, %c0_6] : memref<16x16xf32, #tpu.memory_space<vmem>>, vector<16x16xf32>
    %cst_7 = arith.constant dense<0.000000e+00> : vector<16x16xf32>
    %8 = tpu.matmul %6, %7, %cst_7 {dimension_numbers = #tpu.dot_dimension_numbers<[1], [0], [0], [1], [0, 0, 1, 1], [], []>} : vector<16x16xf32>, vector<16x16xf32>, vector<16x16xf32> -> vector<16x16xf32>
    %c0_8 = arith.constant 0 : index
    %c0_9 = arith.constant 0 : index
    %9 = vector.load %arg5[%c0_8, %c0_9] : memref<1x16xf32, #tpu.memory_space<vmem>>, vector<1x16xf32>
    %10 = vector.broadcast %9 : vector<1x16xf32> to vector<16x16xf32>
    %11 = arith.addf %8, %10 : vector<16x16xf32>
    %12 = math.tanh %11 : vector<16x16xf32>
    %c0_10 = arith.constant 0 : index
    %c0_11 = arith.constant 0 : index
    %13 = vector.load %arg6[%c0_10, %c0_11] : memref<16x8xf32, #tpu.memory_space<vmem>>, vector<16x8xf32>
    %cst_12 = arith.constant dense<0.000000e+00> : vector<16x8xf32>
    %14 = tpu.matmul %12, %13, %cst_12 {dimension_numbers = #tpu.dot_dimension_numbers<[1], [0], [0], [1], [0, 0, 1, 1], [], []>} : vector<16x16xf32>, vector<16x8xf32>, vector<16x8xf32> -> vector<16x8xf32>
    %c0_13 = arith.constant 0 : index
    %c0_14 = arith.constant 0 : index
    %15 = vector.load %arg7[%c0_13, %c0_14] : memref<1x8xf32, #tpu.memory_space<vmem>>, vector<1x8xf32>
    %16 = vector.broadcast %15 : vector<1x8xf32> to vector<16x8xf32>
    %17 = arith.addf %14, %16 : vector<16x8xf32>
    %c0_15 = arith.constant 0 : index
    %c0_16 = arith.constant 0 : index
    %18 = vector.load %arg8[%c0_15, %c0_16] : memref<16x8xf32, #tpu.memory_space<vmem>>, vector<16x8xf32>
    tpu.vector_store %arg8[%c0_15, %c0_16], %17 {strides = array<i32>} : memref<16x8xf32, #tpu.memory_space<vmem>>, vector<16x8xf32>,
    return
  }
  func.func @transform_0(%arg0: i32) -> (i32, i32) {
    %c0_i32 = arith.constant 0 : i32
    %c0_i32_0 = arith.constant 0 : i32
    return %arg0, %c0_i32 : i32, i32
  }
  func.func @transform_1(%arg0: i32) -> (i32, i32) {
    %c0_i32 = arith.constant 0 : i32
    %c0_i32_0 = arith.constant 0 : i32
    %c0_i32_1 = arith.constant 0 : i32
    return %c0_i32, %c0_i32_0 : i32, i32
  }
  func.func @transform_2(%arg0: i32) -> (i32, i32) {
    %c0_i32 = arith.constant 0 : i32
    %c0_i32_0 = arith.constant 0 : i32
    %c0_i32_1 = arith.constant 0 : i32
    return %c0_i32, %c0_i32_0 : i32, i32
  }
  func.func @transform_3(%arg0: i32) -> (i32, i32) {
    %c0_i32 = arith.constant 0 : i32
    %c0_i32_0 = arith.constant 0 : i32
    %c0_i32_1 = arith.constant 0 : i32
    return %c0_i32, %c0_i32_0 : i32, i32
  }
  func.func @transform_4(%arg0: i32) -> (i32, i32) {
    %c0_i32 = arith.constant 0 : i32
    %c0_i32_0 = arith.constant 0 : i32
    %c0_i32_1 = arith.constant 0 : i32
    return %c0_i32, %c0_i32_0 : i32, i32
  }
  func.func @transform_5(%arg0: i32) -> (i32, i32) {
    %c0_i32 = arith.constant 0 : i32
    %c0_i32_0 = arith.constant 0 : i32
    %c0_i32_1 = arith.constant 0 : i32
    return %c0_i32, %c0_i32_0 : i32, i32
  }
  func.func @transform_6(%arg0: i32) -> (i32, i32) {
    %c0_i32 = arith.constant 0 : i32
    %c0_i32_0 = arith.constant 0 : i32
    %c0_i32_1 = arith.constant 0 : i32
    return %c0_i32, %c0_i32_0 : i32, i32
  }
  func.func @transform_7(%arg0: i32) -> (i32, i32) {
    %c0_i32 = arith.constant 0 : i32
    %c0_i32_0 = arith.constant 0 : i32
    return %arg0, %c0_i32 : i32, i32
  }
}

</mosaic_0001>

<bundles_post_ra>
// kernel: tpu_custom_call.1
= control target key start
LH: loop header
LB: loop body
LE: loop exit
PB: predicated region body
PF: predicated region fallthrough
CT: control target
= control target key end

     0   :  { %vm39_vm0 = vcmask 261120   ;;  %vm132_vm1 = vcmask 130048   ;;  %vm306_vm2 = vcmask 64512   ;;  %s474_s1 = inlined_call_operand.vmem [shape: f32[32,16], index: 1, kind: input, shape index: {}]   ;;  %s475_s0 = inlined_call_operand.vmem [shape: f32[16,32], index: 0, kind: input, shape index: {}]   ;;  %s476_s3 = inlined_call_operand.vmem [shape: f32[16,16], index: 3, kind: input, shape index: {}]   ;;  %s477_s2 = inlined_call_operand.vmem [shape: f32[1,16], index: 2, kind: input, shape index: {}]   ;;  %s478_s5 = inlined_call_operand.vmem [shape: f32[16,8], index: 5, kind: input, shape index: {}]   ;;  %s479_s4 = inlined_call_operand.vmem [shape: f32[1,16], index: 4, kind: input, shape index: {}]   ;;  %s480_s6 = inlined_call_operand.vmem [shape: f32[1,8], index: 6, kind: input, shape index: {}]   ;;  %s481_s7 = inlined_call_operand.vmem [shape: f32[16,8], index: 7, kind: output, shape index: {}]  }
   0x1   :  { %v28_v0 = vld [vmem:[%s474_s1] sm:$0xff]  ;;  %v29_v1 = vld [vmem:[%s474_s1 + $0x8] sm:$0xff]  ;;  %v30_v2 = vld [vmem:[%s474_s1 + $0x10] sm:$0xff] }
   0x2   :  { %v361_v3 = vpack.c.bf16 %v29_v1, %v28_v0  ;;  %v31_v4 = vld [vmem:[%s474_s1 + $0x18] sm:$0xff]  ;;  %v26_v5 = vld [vmem:[%s475_s0] sm:$0xff]  ;;  %v27_v7 = vld [vmem:[%s475_s0 + $0x8] sm:$0xff] }
   0x3   :  { %v365_v6 = vpack.c.bf16 %v31_v4, %v30_v2  ;;  %344 = vmatprep.mubr.msk.f32.mxu0 %vm39_vm0, %v26_v5  ;;  %v123_v8 = vld [vmem:[%s476_s3] sm:$0xff]  ;;  %v124_v9 = vld [vmem:[%s476_s3 + $0x8] sm:$0xff] }
   0x4   :  { %362 = vmatprep.subr.bf16.mxu0 %v361_v3  ;;  %v369_v10 = vpack.c.bf16 %v124_v9, %v123_v8  ;;  %v313_v11 = vld [vmem:[%s477_s2] ss:$0 sm:$0xff]  ;;  %v217_v19 = vld [vmem:[%s478_s5 + $0x8] sm:$0xff] }
   0x5   :  { %364 = vmatpush3.bf16.msra.mxu0 %v361_v3  ;;  %v216_v18 = vld [vmem:[%s478_s5] sm:$0xff] }
   0x6   :  { %366 = vmatprep.subr.bf16.mxu0 %v365_v6  ;;  %370 = vmatprep.subr.bf16.mxu1 %v369_v10  ;;  %v373_v20 = vpack.c.bf16 %v217_v19, %v216_v18  ;;  %v316_v21 = vld [vmem:[%s479_s4] ss:$0 sm:$0xff] }
   0x7   :  { %372 = vmatpush3.bf16.msra.mxu1 %v369_v10  ;;  %v319_v28 = vld [vmem:[%s480_s6] ss:$0 sm:$0xff] }
   0x8   :  { %374 = vmatprep.subr.bf16.mxu1 %v373_v20 }
   0x9   :  { %368 = vmatpush3.bf16.msra.mxu0 %v365_v6 }
   0xc   :  { %345 = vmatmul.mubr.msk.f32.vlgmr.msra.gmra.mrb[0].mxu0 %vm39_vm0, %v27_v7 }
  0xdf   :  { %v346_v12 = vpop.f32.mrb[0].mxu0 }
  0xe0   :  { %v118_v13 = vadd.f32 %v346_v12, %v313_v11  ;;  %v112_v14 = vpop.f32.mrb[1].mxu0 }
  0xe1   :  { %v113_v15 = vadd.f32 %v313_v11, %v112_v14 }
  0xe3   :  { %377 = vtanh.f32 %v113_v15 }
  0xe4   :  { %379 = vtanh.f32 %v118_v13 }
  0xed   :  { %v378_v16 = vpop.eup %377 }
  0xee   :  { %v380_v17 = vpop.eup %379  ;;  %351 = vmatprep.mubr.msk.f32.mxu1 %vm132_vm1, %v378_v16 }
  0xef   :  { %352 = vmatmul.mubr.msk.f32.vlgmr.msra.gmra.mrb[0].mxu1 %vm132_vm1, %v380_v17 }
  0xf0   :  { %376 = vmatpush3.bf16.msra.mxu1 %v373_v20 }
 0x1c2   :  { %v353_v22 = vpop.f32.mrb[0].mxu1 }
 0x1c3   :  { %v211_v23 = vadd.f32 %v353_v22, %v316_v21  ;;  %v205_v24 = vpop.f32.mrb[1].mxu1 }
 0x1c4   :  { %v206_v25 = vadd.f32 %v316_v21, %v205_v24 }
 0x1c6   :  { %381 = vtanh.f32 %v206_v25 }
 0x1c7   :  { %383 = vtanh.f32 %v211_v23 }
 0x1d0   :  { %v382_v26 = vpop.eup %381 }
 0x1d1   :  { %v384_v27 = vpop.eup %383  ;;  %358 = vmatprep.mubr.msk.f32.mxu1 %vm132_vm1, %v382_v26 }
 0x1d2   :  { %359 = vmatmul.mubr.msk.f32.vlgmr.msra.gmra.mrb[2].mxu1 %vm132_vm1, %v384_v27 }
 0x2a5   :  { %v360_v29 = vpop.f32.mrb[2].mxu1 }
 0x2a6   :  { %v303_v30 = vadd.f32 %v360_v29, %v319_v28  ;;  %v297_v31 = vpop.f32.mrb[3].mxu1 }
 0x2a7   :  { %v298_v32 = vadd.f32 %v319_v28, %v297_v31 }
 0x2a8   :  { %308 = vst.msk [vmem:[%s481_s7 + $0x8] sm:$0xff] %vm306_vm2, %v303_v30 }
 0x2a9   :  { %307 = vst.msk [vmem:[%s481_s7] sm:$0xff] %vm306_vm2, %v298_v32 }

</bundles_post_ra>
